<compile_context>
chip_gen: v7x
topology: tpu7x:2x2x1
jax: 0.10.0
libtpu: 0.0.40
codegen_flags: <defaults>
</compile_context>

<pallas_src>
import functools

import jax
import jax.numpy as jnp
from jax.experimental import pallas as pl
from jax.experimental.pallas import tpu as pltpu

LANE = 128      # lane width (last-dim tiling unit)
SUBLANE = 8     # f32 sublane height (second-to-last-dim tiling unit)


def _round_up(v, m):
    return ((v + m - 1) // m) * m


def _vmem_cap_bytes():
    """Per-TensorCore VMEM budget with headroom for Mosaic internal scratch."""
    try:
        kind = jax.devices()[0].device_kind.lower()
    except Exception:
        return 64 * 1024 * 1024
    if "v7" in kind or "7x" in kind:
        # 64 MiB physical per TC on v7x: never clamp at 64, leave ~8 MiB headroom.
        return 56 * 1024 * 1024
    # v5e / v6e have 128 MiB physical VMEM per TC.
    return 100 * 1024 * 1024


# ---------------------------------------------------------------------------
# Kernels
# ---------------------------------------------------------------------------
def mlp_kernel(x_ref, w1_ref, b1_ref, w2_ref, b2_ref, o_ref):
    """Fused Linear -> Sigmoid -> Linear -> Sigmoid on one (tm, K) batch tile."""
    x = x_ref[...]
    w1 = w1_ref[...]
    w2 = w2_ref[...]
    # MXU matmul with f32 accumulation; bias add + sigmoid in f32 (VPU/EUP).
    h = jnp.dot(x, w1, preferred_element_type=jnp.float32) + b1_ref[...]
    # Explicit, intentional cast of the hidden activation to the matmul compute
    # dtype (bf16 fast path when enabled; no-op for f32).
    h = jax.nn.sigmoid(h).astype(w2.dtype)
    y = jnp.dot(h, w2, preferred_element_type=jnp.float32) + b2_ref[...]
    o_ref[...] = jax.nn.sigmoid(y).astype(o_ref.dtype)


def mlp_kernel_ktiled(x_ref, w1_ref, b1_ref, w2_ref, b2_ref, o_ref, acc_ref):
    """Same fusion, but layer-1's reduction dim is tiled over grid axis 1.

    acc_ref is an f32 VMEM accumulator; the sigmoid/layer-2 epilogue runs only
    on the last K step (canonical init/accumulate/finalize pattern).
    """
    k = pl.program_id(1)

    @pl.when(k == 0)
    def _init():
        acc_ref[...] = jnp.zeros_like(acc_ref)

    acc_ref[...] += jnp.dot(x_ref[...], w1_ref[...],
                            preferred_element_type=jnp.float32)

    @pl.when(k == pl.num_programs(1) - 1)
    def _finalize():
        w2 = w2_ref[...]
        h = jax.nn.sigmoid(acc_ref[...] + b1_ref[...]).astype(w2.dtype)
        y = jnp.dot(h, w2, preferred_element_type=jnp.float32) + b2_ref[...]
        o_ref[...] = jax.nn.sigmoid(y).astype(o_ref.dtype)


# ---------------------------------------------------------------------------
# One-time parameter preparation (hoisted out of the per-call path)
# ---------------------------------------------------------------------------
def prepare_params(w1, b1, w2, b2, *, compute_dtype=jnp.float32, block_k=None,
                   max_resident_weight_bytes=None):
    """Cast/pad the static parameters ONCE.

    w1: (in_features, out_features), w2: (out_features, out_features),
    b1/b2: (1, out_features) or (out_features,).
    compute_dtype: dtype fed to the MXU.  jnp.bfloat16 is recommended for large
    shapes on v5e/v6e AND v7x (halves resident-weight VMEM, full-rate MXU;
    accumulation is always f32 — note it does compound rounding through layer 2).
    """
    K, N = w1.shape
    cd = jnp.dtype(compute_dtype)
    cd_bytes = cd.itemsize

    # Lane-dense output features: pad N to a multiple of 128 only when padding
    # is actually needed and N is big enough for lane density to matter.
    N_pad = N if (N % LANE == 0 or N <= LANE) else _round_up(N, LANE)

    # Decide whether layer-1 weights must be K-tiled; otherwise both weight
    # matrices stay fully VMEM-resident (breaks on v7x's 64 MiB/TC for big K/N).
    if max_resident_weight_bytes is None:
        max_resident_weight_bytes = _vmem_cap_bytes() // 4
    resident_bytes = (K * N_pad + N_pad * N_pad) * cd_bytes
    if block_k is None:
        if resident_bytes <= max_resident_weight_bytes or K <= 2 * LANE:
            block_k = K
        else:
            block_k = 4 * LANE
    if block_k < K:
        block_k = max(LANE, (block_k // LANE) * LANE)
        K_pad = _round_up(K, block_k)
    else:
        block_k = K
        K_pad = K
    # TODO(synk): for N so large that W2 alone (N_pad^2) overflows VMEM, also
    # tile the layer-2 output columns; not needed for the shapes used here.

    b1 = jnp.reshape(b1, (1, N))
    b2 = jnp.reshape(b2, (1, N))
    if K_pad == K and N_pad == N:
        # Aligned: no padded copies at all.
        w1p, w2p = w1.astype(cd), w2.astype(cd)
        b1p, b2p = b1.astype(jnp.float32), b2.astype(jnp.float32)
    else:
        # Zero padding is mathematically transparent: padded K rows/cols add 0
        # in layer 1; padded hidden lanes (sigmoid(0)=0.5) hit zero W2 rows, so
        # they never reach real outputs; padded output columns are sliced off.
        w1p = jnp.zeros((K_pad, N_pad), cd).at[:K, :N].set(w1.astype(cd))
        w2p = jnp.zeros((N_pad, N_pad), cd).at[:N, :N].set(w2.astype(cd))
        b1p = jnp.zeros((1, N_pad), jnp.float32).at[:, :N].set(b1.astype(jnp.float32))
        b2p = jnp.zeros((1, N_pad), jnp.float32).at[:, :N].set(b2.astype(jnp.float32))

    return {"w1": w1p, "b1": b1p, "w2": w2p, "b2": b2p,
            "in_features": K, "out_features": N, "block_k": block_k}


# ---------------------------------------------------------------------------
# Forward
# ---------------------------------------------------------------------------
def _tile_vmem_bytes(tm, block_k, n_pad, cd_bytes, out_bytes, k_tiled):
    weights = (block_k * n_pad + n_pad * n_pad) * cd_bytes + 2 * n_pad * 4
    return (2 * tm * block_k * cd_bytes          # pipelined x tiles (2 bufs)
            + 2 * tm * n_pad * out_bytes         # pipelined out tiles (2 bufs)
            + 2 * weights                        # resident weights/biases (2 bufs default)
            + (tm * n_pad * 4 if k_tiled else 0)  # f32 accumulator scratch
            + 2 * tm * n_pad * 4)                # f32 h / y intermediates


@functools.partial(
    jax.jit, static_argnames=("n_out", "tm", "block_k", "vmem_limit", "small"))
def _forward_impl(x, w1, b1, w2, b2, *, n_out, tm, block_k, vmem_limit, small):
    B, K = x.shape
    K_w, N_pad = w1.shape
    cd = w1.dtype
    out_dtype = x.dtype

    xc = x.astype(cd) if x.dtype != cd else x

    if small:
        # Tiny problem: one grid-less pallas_call, full-array blocks, no padding.
        out = pl.pallas_call(
            mlp_kernel,
            out_shape=jax.ShapeDtypeStruct((B, N_pad), out_dtype),
        )(xc, w1, b1, w2, b2)
    else:
        # Zero-pad the reduction dim only when the (hoisted) weights were K-padded.
        if K_w != K:
            xc = jnp.zeros((B, K_w), cd).at[:, :K].set(xc)
        nb = pl.cdiv(B, tm)   # ragged last batch tile: OOB rows dropped on store
        if block_k >= K_w:
            # Weights/biases VMEM-resident via constant index_maps; batch-only grid.
            # TODO(synk): single-buffer the constant weight operands
            # (pipeline_mode=pl.Buffered(1)) if VMEM residency becomes tight.
            out = pl.pallas_call(
                mlp_kernel,
                out_shape=jax.ShapeDtypeStruct((B, N_pad), out_dtype),
                grid=(nb,),
                in_specs=[
                    pl.BlockSpec((tm, K_w), lambda i: (i, 0)),       # x tiles
                    pl.BlockSpec((K_w, N_pad), lambda i: (0, 0)),    # W1 resident
                    pl.BlockSpec((1, N_pad), lambda i: (0, 0)),      # b1 resident
                    pl.BlockSpec((N_pad, N_pad), lambda i: (0, 0)),  # W2 resident
                    pl.BlockSpec((1, N_pad), lambda i: (0, 0)),      # b2 resident
                ],
                out_specs=pl.BlockSpec((tm, N_pad), lambda i: (i, 0)),
                compiler_params=pltpu.CompilerParams(
                    dimension_semantics=("parallel",),
                    vmem_limit_bytes=vmem_limit,
                ),
            )(xc, w1, b1, w2, b2)
        else:
            # Large-weight path: tile layer-1's reduction dim (K) as well.
            out = pl.pallas_call(
                mlp_kernel_ktiled,
                out_shape=jax.ShapeDtypeStruct((B, N_pad), out_dtype),
                grid=(nb, K_w // block_k),
                in_specs=[
                    pl.BlockSpec((tm, block_k), lambda i, k: (i, k)),
                    pl.BlockSpec((block_k, N_pad), lambda i, k: (k, 0)),
                    pl.BlockSpec((1, N_pad), lambda i, k: (0, 0)),
                    pl.BlockSpec((N_pad, N_pad), lambda i, k: (0, 0)),
                    pl.BlockSpec((1, N_pad), lambda i, k: (0, 0)),
                ],
                out_specs=pl.BlockSpec((tm, N_pad), lambda i, k: (i, 0)),
                scratch_shapes=[pltpu.VMEM((tm, N_pad), jnp.float32)],
                compiler_params=pltpu.CompilerParams(
                    dimension_semantics=("parallel", "arbitrary"),
                    vmem_limit_bytes=vmem_limit,
                ),
            )(xc, w1, b1, w2, b2)

    if N_pad != n_out:
        out = out[:, :n_out]   # only when output features actually needed padding
    return out


def mymodel_forward(x, params, *, block_batch=512):
    """Pallas implementation of MyModel.forward.

    x:      (B, in_features) float array (output keeps x.dtype).
    params: dict returned by prepare_params().
    """
    w1, b1, w2, b2 = params["w1"], params["b1"], params["w2"], params["b2"]
    B, _ = x.shape
    K_w, N_pad = w1.shape
    n_out = params["out_features"]
    block_k = params["block_k"]
    cd = w1.dtype
    cd_bytes = jnp.dtype(cd).itemsize
    out_bytes = jnp.dtype(x.dtype).itemsize

    small = B <= 256 and K_w <= 512 and N_pad <= 512 and block_k == K_w
    if small:
        tm, vmem_limit = B, 0
    else:
        mult = 16 if cd == jnp.dtype(jnp.bfloat16) else SUBLANE  # bf16 sublane packing
        tm = _round_up(min(block_batch, _round_up(B, mult)), mult)
        cap = _vmem_cap_bytes()
        k_tiled = block_k < K_w
        # Treat a VMEM-budget overflow as a retiling signal (shrink tm), not a clamp.
        while (_tile_vmem_bytes(tm, block_k, N_pad, cd_bytes, out_bytes, k_tiled) > cap
               and tm > mult):
            tm = max(mult, _round_up(tm // 2, mult))
        est = _tile_vmem_bytes(tm, block_k, N_pad, cd_bytes, out_bytes, k_tiled)
        vmem_limit = int(min(max(2 * est, 32 * 1024 * 1024), cap))

    out = _forward_impl(x, w1, b1, w2, b2, n_out=n_out, tm=tm,
                        block_k=block_k, vmem_limit=vmem_limit, small=small)
    # Mirror the torch module's prints (host-side shape reporting only).
    print(f"\tIn model: input size: {x.shape}")
    print(f"\t          output size: {out.shape}")
    return out


def init_params(key, input_size, output_size):
    # Mimics PyTorch's default Linear init: U(-1/sqrt(fan_in), 1/sqrt(fan_in)).
    k1, k2, k3, k4 = jax.random.split(key, 4)
    bound1 = 1.0 / jnp.sqrt(input_size)
    bound2 = 1.0 / jnp.sqrt(output_size)
    w1 = jax.random.uniform(k1, (input_size, output_size), jnp.float32, -bound1, bound1)
    b1 = jax.random.uniform(k2, (1, output_size), jnp.float32, -bound1, bound1)
    w2 = jax.random.uniform(k3, (output_size, output_size), jnp.float32, -bound2, bound2)
    b2 = jax.random.uniform(k4, (1, output_size), jnp.float32, -bound2, bound2)
    return w1, b1, w2, b2


if __name__ == "__main__":
    key = jax.random.PRNGKey(0)
    kx, kp, kx2 = jax.random.split(key, 3)

    # --- tiny demo shapes (matches the PyTorch module's toy usage) ------------
    batch, input_size, output_size = 8, 32, 32
    x = jax.random.normal(kx, (batch, input_size), dtype=jnp.float32)
    w1, b1, w2, b2 = init_params(kp, input_size, output_size)
    ref = jax.nn.sigmoid(jax.nn.sigmoid(x @ w1 + b1) @ w2 + b2)

    params = prepare_params(w1, b1, w2, b2)                      # f32, small path
    out = jax.block_until_ready(mymodel_forward(x, params))
    assert out.shape == (batch, output_size)
    assert jnp.allclose(out, ref, atol=1e-5, rtol=1e-5)

    params_bf16 = prepare_params(w1, b1, w2, b2, compute_dtype=jnp.bfloat16)
    out_bf16 = jax.block_until_ready(mymodel_forward(x, params_bf16))
    assert jnp.allclose(out_bf16, ref, atol=3e-2, rtol=3e-2)

    # --- medium shapes: exercise the tiled paths ------------------------------
    # Aligned feature dims (no per-call padding/slicing), ragged batch tail,
    # and the K-tiled accumulator variant.
    B2, K2, N2 = 300, 256, 384
    x2 = jax.random.normal(kx2, (B2, K2), dtype=jnp.float32)
    w1b, b1b, w2b, b2b = init_params(jax.random.fold_in(kp, 1), K2, N2)
    ref2 = jax.nn.sigmoid(jax.nn.sigmoid(x2 @ w1b + b1b) @ w2b + b2b)
    # Tolerance covers TPU default f32 matmul precision / accumulation order.
    tol = 5e-3

    params2 = prepare_params(w1b, b1b, w2b, b2b)                 # resident weights
    out2 = jax.block_until_ready(mymodel_forward(x2, params2, block_batch=128))
    assert out2.shape == (B2, N2)
    assert jnp.allclose(out2, ref2, atol=tol, rtol=tol)

    params2k = prepare_params(w1b, b1b, w2b, b2b, block_k=128)   # force K tiling
    out2k = jax.block_until_ready(mymodel_forward(x2, params2k, block_batch=128))
    assert out2k.shape == (B2, N2)
    assert jnp.allclose(out2k, ref2, atol=tol, rtol=tol)

    print("KERNEL_OK")
</pallas_src>

<mosaic_0001>
module attributes {stable_mosaic.version = 11 : i64} {
  func.func @mlp_kernel(%arg0: memref<8x32xf32, #tpu.memory_space<vmem>>, %arg1: memref<32x32xf32, #tpu.memory_space<vmem>>, %arg2: memref<1x32xf32, #tpu.memory_space<vmem>>, %arg3: memref<32x32xf32, #tpu.memory_space<vmem>>, %arg4: memref<1x32xf32, #tpu.memory_space<vmem>>, %arg5: memref<8x32xf32, #tpu.memory_space<vmem>>) attributes {dimension_semantics = [], scalar_prefetch = 0 : i64, scratch_operands = 0 : i64, tpu.core_type = #tpu.core_type<tc>} {
    %c0 = arith.constant 0 : index
    %c0_0 = arith.constant 0 : index
    %0 = vector.load %arg0[%c0, %c0_0] : memref<8x32xf32, #tpu.memory_space<vmem>>, vector<8x32xf32>
    %c0_1 = arith.constant 0 : index
    %c0_2 = arith.constant 0 : index
    %1 = vector.load %arg1[%c0_1, %c0_2] : memref<32x32xf32, #tpu.memory_space<vmem>>, vector<32x32xf32>
    %c0_3 = arith.constant 0 : index
    %c0_4 = arith.constant 0 : index
    %2 = vector.load %arg3[%c0_3, %c0_4] : memref<32x32xf32, #tpu.memory_space<vmem>>, vector<32x32xf32>
    %cst = arith.constant dense<0.000000e+00> : vector<8x32xf32>
    %3 = tpu.matmul %0, %1, %cst {dimension_numbers = #tpu.dot_dimension_numbers<[1], [0], [0], [1], [0, 0, 1, 1], [], []>} : vector<8x32xf32>, vector<32x32xf32>, vector<8x32xf32> -> vector<8x32xf32>
    %c0_5 = arith.constant 0 : index
    %c0_6 = arith.constant 0 : index
    %4 = vector.load %arg2[%c0_5, %c0_6] : memref<1x32xf32, #tpu.memory_space<vmem>>, vector<1x32xf32>
    %5 = vector.broadcast %4 : vector<1x32xf32> to vector<8x32xf32>
    %6 = arith.addf %3, %5 : vector<8x32xf32>
    %7 = arith.negf %6 : vector<8x32xf32>
    %8 = math.exp %7 : vector<8x32xf32>
    %cst_7 = arith.constant 1.000000e+00 : f32
    %9 = vector.broadcast %cst_7 : f32 to vector<8x32xf32>
    %10 = arith.addf %9, %8 : vector<8x32xf32>
    %11 = arith.divf %9, %10 : vector<8x32xf32>
    %cst_8 = arith.constant dense<0.000000e+00> : vector<8x32xf32>
    %12 = tpu.matmul %11, %2, %cst_8 {dimension_numbers = #tpu.dot_dimension_numbers<[1], [0], [0], [1], [0, 0, 1, 1], [], []>} : vector<8x32xf32>, vector<32x32xf32>, vector<8x32xf32> -> vector<8x32xf32>
    %c0_9 = arith.constant 0 : index
    %c0_10 = arith.constant 0 : index
    %13 = vector.load %arg4[%c0_9, %c0_10] : memref<1x32xf32, #tpu.memory_space<vmem>>, vector<1x32xf32>
    %14 = vector.broadcast %13 : vector<1x32xf32> to vector<8x32xf32>
    %15 = arith.addf %12, %14 : vector<8x32xf32>
    %16 = arith.negf %15 : vector<8x32xf32>
    %17 = math.exp %16 : vector<8x32xf32>
    %cst_11 = arith.constant 1.000000e+00 : f32
    %18 = vector.broadcast %cst_11 : f32 to vector<8x32xf32>
    %19 = arith.addf %18, %17 : vector<8x32xf32>
    %20 = arith.divf %18, %19 : vector<8x32xf32>
    %c0_12 = arith.constant 0 : index
    %c0_13 = arith.constant 0 : index
    %21 = vector.load %arg5[%c0_12, %c0_13] : memref<8x32xf32, #tpu.memory_space<vmem>>, vector<8x32xf32>
    tpu.vector_store %arg5[%c0_12, %c0_13], %20 {strides = array<i32>} : memref<8x32xf32, #tpu.memory_space<vmem>>, vector<8x32xf32>,
    return
  }
}

</mosaic_0001>

<bundles_post_ra>
// kernel: _forward_impl.1
= control target key start
LH: loop header
LB: loop body
LE: loop exit
PB: predicated region body
PF: predicated region fallthrough
CT: control target
= control target key end

     0   :  { %10 = vsyncpa [#allocation3], 0  ;;  %s522_s0 = inlined_call_operand.hbm [shape: f32[8,32], index: 0, kind: input, shape index: {}]   ;;  %s523_s1 = inlined_call_operand.hbm [shape: f32[32,32], index: 1, kind: input, shape index: {}]   ;;  %s524_s2 = inlined_call_operand.vmem [shape: f32[1,32], index: 2, kind: input, shape index: {}]   ;;  %s525_s3 = inlined_call_operand.hbm [shape: f32[32,32], index: 3, kind: input, shape index: {}]   ;;  %s526_s4 = inlined_call_operand.vmem [shape: f32[1,32], index: 4, kind: input, shape index: {}]   ;;  %s527_s5 = inlined_call_operand.hbm [shape: f32[8,32], index: 5, kind: output, shape index: {}]  }
   0x1   :  { %11 = vsyncpa [#allocation6], 0 }
   0x2   :  { %12 = vsyncpa [#allocation4], 0  ;;  %s420_s18 = smov [#allocation5]   ;;  %s326_s22 = scalar_lea.hbm %s523_s1, 512 }
   0x3   :  { %s28_s19 = sshll.u32 %s420_s18, 4  ;;  %p327_p0 = scmp.ne.s32.totalorder %s523_s1, %s326_s22  ;;  %s29_s19 = int_to_ptr.vmem [resolvable:$true] %s28_s19 }
   0x4   :  { %p330_p1 = scmp.lt.u32.totalorder %s326_s22, %s523_s1 }
   0x6   :  { %p332_p2 = pnand %p330_p1, %p327_p0 }
   0x8   :  { %335 = shalt.err (!%p332_p2)
}
   0x9   :  { %s336_s27 = scalar_lea.vmem %s29_s19, 512  ;;  %p341_p4 = scmp.lt.s32.totalorder %s29_s19, %s29_s19 }
   0xa   :  { %p337_p3 = scmp.ne.s32.totalorder %s29_s19, %s336_s27  ;;  %p342_p5 = scmp.lt.s32.totalorder %s336_s27, %s336_s27 }
   0xc   :  { %p343_p6 = por %p342_p5, %p341_p4 }
   0xe   :  { %p344_p7 = pnand %p343_p6, %p337_p3 }
  0x10   :  { %347 = shalt.err (!%p344_p7)
}
  0x11   :  { %s421_s28 = smov 128   ;;  %s422_s29 = smov 8  }
  0x12   :  { %34 = dma.hbm_to_vmem [thread:$0]  %s523_s1, 512, %s29_s19, [#allocation6], %s421_s28, %s421_s28, %s422_s29  }
  0x13   :  { %s423_s7 = smov [#allocation2]   ;;  %s424_s9 = smov [#allocation7]  }
  0x14   :  { %s19_s8 = sshll.u32 %s423_s7, 4  ;;  %s42_s10 = sshll.u32 %s424_s9, 4  ;;  %s20_s8 = int_to_ptr.vmem [resolvable:$true] %s19_s8  ;;  %s43_s10 = int_to_ptr.vmem [resolvable:$true] %s42_s10 }
  0x15   :  { %s348_s13 = scalar_lea.hbm %s522_s0, 128 }
  0x16   :  { %p349_p8 = scmp.ne.s32.totalorder %s522_s0, %s348_s13  ;;  %p352_p9 = scmp.lt.u32.totalorder %s348_s13, %s522_s0 }
  0x18   :  { %p354_p10 = pnand %p352_p9, %p349_p8 }
  0x1a   :  { %357 = shalt.err (!%p354_p10)
}
  0x1b   :  { %s358_s1 = scalar_lea.vmem %s20_s8, 128  ;;  %p363_p12 = scmp.lt.s32.totalorder %s20_s8, %s20_s8 }
  0x1c   :  { %p359_p11 = scmp.ne.s32.totalorder %s20_s8, %s358_s1  ;;  %p364_p13 = scmp.lt.s32.totalorder %s358_s1, %s358_s1 }
  0x1e   :  { %p365_p0 = por %p364_p13, %p363_p12 }
  0x20   :  { %p366_p1 = pnand %p365_p0, %p359_p11 }
  0x22   :  { %369 = shalt.err (!%p366_p1)
}
  0x23   :  { %22 = dma.hbm_to_vmem [thread:$0]  %s522_s0, 128, %s20_s8, [#allocation3]  }
  0x24   :  { %s370_s22 = scalar_lea.hbm %s525_s3, 512 }
  0x25   :  { %p371_p2 = scmp.ne.s32.totalorder %s525_s3, %s370_s22  ;;  %p374_p3 = scmp.lt.u32.totalorder %s370_s22, %s525_s3 }
  0x27   :  { %p376_p4 = pnand %p374_p3, %p371_p2 }
  0x29   :  { %379 = shalt.err (!%p376_p4)
}
  0x2a   :  { %s380_s27 = scalar_lea.vmem %s43_s10, 512  ;;  %p385_p6 = scmp.lt.s32.totalorder %s43_s10, %s43_s10 }
  0x2b   :  { %p381_p5 = scmp.ne.s32.totalorder %s43_s10, %s380_s27  ;;  %p386_p7 = scmp.lt.s32.totalorder %s380_s27, %s380_s27 }
  0x2d   :  { %p387_p8 = por %p386_p7, %p385_p6 }
  0x2f   :  { %p388_p9 = pnand %p387_p8, %p381_p5 }
  0x31   :  { %391 = shalt.err (!%p388_p9)
}
  0x32   :  { %48 = dma.hbm_to_vmem [thread:$0]  %s525_s3, 512, %s43_s10, [#allocation6], %s421_s28, %s421_s28, %s422_s29  }
  0x33   :  { %414 = dma.done.wait [#allocation3], 128  }
  0x34   :  { %415 = vsyncadd [#allocation3], 4294967168 }
  0x35   :  { %416 = dma.done.wait [#allocation6], 1024  }
  0x36   :  { %417 = vsyncadd [#allocation6], 4294966272  ;;  %v425_v0 = vmov 0.0|0.0   ;;  %vm426_vm0 = vmmov 0   ;;  %v427_v1 = vmov 0.0   ;;  %v61_v2 = vld [vmem:[#allocation5] sm:$0xff] }
  0x37   :  { %297 = vmatprep.subr.bf16.mxu0 %v425_v0  ;;  %283 = vmatprep.mubr.msk.f32.mxu0 %vm426_vm0, %v427_v1  ;;  %v62_v3 = vld [vmem:[#allocation5 + $0x8] sm:$0xff]  ;;  %v63_v4 = vld [vmem:[#allocation5 + $0x10] sm:$0xff]  ;;  %v64_v6 = vld [vmem:[#allocation5 + $0x18] sm:$0xff]  ;;  %vm76_vm1 = vcmask 261120  }
  0x38   :  { %303 = vmatprep.subr.bf16.mxu1 %v425_v0  ;;  %294 = vmatprep.mubr.msk.f32.mxu1 %vm426_vm0, %v427_v1  ;;  %v298_v5 = vpack.c.bf16 %v62_v3, %v61_v2  ;;  %v301_v7 = vpack.c.bf16 %v64_v6, %v63_v4  ;;  %v60_v8 = vld [vmem:[#allocation2] sm:$0xff]  ;;  %v65_v9 = vld [vmem:[#allocation7] sm:$0xff]  ;;  %v66_v10 = vld [vmem:[#allocation7 + $0x8] sm:$0xff] }
  0x39   :  { %v67_v11 = vld [vmem:[#allocation7 + $0x10] sm:$0xff]  ;;  %v304_v12 = vpack.c.bf16 %v66_v10, %v65_v9  ;;  %v68_v13 = vld [vmem:[#allocation7 + $0x18] sm:$0xff] }
  0x3a   :  { %299 = vmatpush3.bf16.msra.mxu0 %v298_v5  ;;  %v307_v14 = vpack.c.bf16 %v68_v13, %v67_v11  ;;  %v259_v15 = vld [vmem:[%s524_s2] ss:$0 sm:$0xff]  ;;  %s428_s2 = smov [#allocation8]  }
  0x3b   :  { %300 = vmatprep.subr.bf16.mxu0 %v425_v0  ;;  %305 = vmatpush3.bf16.msra.mxu1 %v304_v12  ;;  %v262_v23 = vld [vmem:[%s526_s4] ss:$0 sm:$0xff]  ;;  %s249_s7 = sshll.u32 %s428_s2, 4  ;;  %s250_s7 = int_to_ptr.vmem [resolvable:$true] %s249_s7 }
  0x3c   :  { %306 = vmatprep.subr.bf16.mxu1 %v425_v0  ;;  %s392_s8 = scalar_lea.vmem %s250_s7, 128  ;;  %p397_p11 = scmp.lt.s32.totalorder %s250_s7, %s250_s7 }
  0x3d   :  { %p393_p10 = scmp.ne.s32.totalorder %s250_s7, %s392_s8  ;;  %p398_p12 = scmp.lt.s32.totalorder %s392_s8, %s392_s8 }
  0x3e   :  { %302 = vmatpush3.bf16.msra.mxu0 %v301_v7 }
  0x3f   :  { %308 = vmatpush3.bf16.msra.mxu1 %v307_v14  ;;  %p399_p13 = por %p398_p12, %p397_p11 }
  0x41   :  { %284 = vmatmul.mubr.msk.f32.vlgmr.msra.gmra.mrb[0].mxu0 %vm76_vm1, %v60_v8  ;;  %p400_p0 = pnand %p399_p13, %p393_p10 }
 0x114   :  { %v146_v16 = vpop.f32.mrb[0].mxu0 }
 0x115   :  { %v147_v17 = vadd.f32 %v259_v15, %v146_v16  ;;  %v285_v18 = vpop.f32.mrb[1].mxu0 }
 0x117   :  { %v261_v19 = vmul.f32 -1.442695, %v147_v17 }
 0x119   :  { %318 = vpow2.f32 %v261_v19 }
 0x123   :  { %v319_v20 = vpop.eup %318 }
 0x124   :  { %v153_v21 = vadd.f32 1.0, %v319_v20 }
 0x126   :  { %320 = vrcp.f32 %v153_v21 }
 0x130   :  { %v321_v22 = vpop.eup %320 }
 0x131   :  { %295 = vmatmul.mubr.msk.f32.vlgmr.msra.gmra.mrb[0].mxu1 %vm76_vm1, %v321_v22 }
 0x204   :  { %v232_v24 = vpop.f32.mrb[0].mxu1 }
 0x205   :  { %v233_v25 = vadd.f32 %v262_v23, %v232_v24  ;;  %v296_v26 = vpop.f32.mrb[1].mxu1 }
 0x207   :  { %v264_v27 = vmul.f32 -1.442695, %v233_v25 }
 0x209   :  { %322 = vpow2.f32 %v264_v27 }
 0x213   :  { %v323_v28 = vpop.eup %322 }
 0x214   :  { %v239_v29 = vadd.f32 1.0, %v323_v28 }
 0x216   :  { %324 = vrcp.f32 %v239_v29 }
 0x220   :  { %v325_v30 = vpop.eup %324 }
 0x221   :  { %242 = vst.msk [vmem:[#allocation8] sm:$0xff] %vm76_vm1, %v325_v30 }
 0x222   :  { %403 = shalt.err (!%p400_p0)
}
 0x223   :  { %s404_s10 = scalar_lea.hbm %s527_s5, 128 }
 0x224   :  { %p405_p1 = scmp.ne.s32.totalorder %s527_s5, %s404_s10  ;;  %p408_p2 = scmp.lt.u32.totalorder %s404_s10, %s527_s5 }
 0x226   :  { %p410_p3 = pnand %p408_p2, %p405_p1 }
 0x228   :  { %413 = shalt.err (!%p410_p3)
}
 0x229   :  { %252 = dma.vmem_to_hbm [thread:$0]  %s250_s7, 128, %s527_s5, [#allocation4]  }
 0x22a   :  { %418 = dma.done.wait [#allocation4], 128  }
 0x22b   :  { %419 = vsyncadd [#allocation4], 4294967168 }
 0x22c   :  { %256 = vsyncpa [#allocation3], 1 }
 0x22d   :  { %257 = vsyncpa [#allocation6], 1 }
 0x22e   :  { %258 = vsyncpa [#allocation4], 1 }

</bundles_post_ra>
